<compile_context>
chip_gen: v6e
topology: v6e:2x2x1
jax: 0.10.0
libtpu: 0.0.40
codegen_flags: <defaults>
</compile_context>

<pallas_src>
import jax
import jax.numpy as jnp
from jax.experimental import pallas as pl
from jax.experimental.pallas import tpu as pltpu

EPS = 1e-6      # torch.nn.functional.pairwise_distance default eps
_LANES = 128


def _round_up(x, m):
    return (x + m - 1) // m * m


def _make_kernel(B, TB):
    """Kernel closure over static batch size B and batch tile TB."""
    ragged = (B % TB) != 0

    def pairwise_distance_kernel(e1_ref, e2_ref, out_ref):
        # (TB, D) tiles; upcast so subtract/square/accumulate happen in f32
        # (matches torch: ||x1 - x2 + eps||_2 over the feature axis).
        diff = e1_ref[...].astype(jnp.float32) - e2_ref[...].astype(jnp.float32) + EPS
        sq = diff * diff                                        # (TB, D) f32

        if ragged:
            # Only the last grid step can read past the batch edge; zero those
            # rows so unspecified OOB data (possibly NaN/Inf) cannot leak into
            # the MXU contraction.  Cheap VPU select, negligible vs DMA.
            row_ids = (pl.program_id(0) * TB
                       + jax.lax.broadcasted_iota(jnp.int32, (TB, 1), 0))
            sq = jnp.where(row_ids < B, sq, 0.0)

        # Lane-dense row reduction on the MXU:
        #   ones(1, D) contracted with sq(TB, D) over D  ->  (1, TB)
        # Batch lands on the lane axis straight out of the MXU; the store is a
        # single lane-contiguous row, no relayout needed.
        ones = jnp.ones((1, sq.shape[-1]), dtype=jnp.float32)
        d2 = jax.lax.dot_general(
            ones, sq,
            dimension_numbers=(((1,), (1,)), ((), ())),          # "NT" contraction
            precision=jax.lax.Precision.HIGHEST,                 # exact f32 sum
            preferred_element_type=jnp.float32,
        )                                                        # (1, TB)
        out_ref[...] = jnp.sqrt(d2)

    return pairwise_distance_kernel


def pairwise_distance(e1, e2, *, block_rows=4096):
    """L2 pairwise distance over the last axis; returns shape (B,) like torch."""
    assert e1.shape == e2.shape and e1.ndim == 2
    B, D = e1.shape

    # Batch tile: multiple of 128 (keeps the (1, TB) output lane-dense).
    # Default cap 4096: at D=128 that's 2 MiB per input block -> 8 MiB of
    # double-buffered input, safe on v5e's 16 MiB scoped default and v7x's
    # 32 MiB, while amortizing the ~0.35 us per-grid-step overhead.
    TB = min(block_rows, _round_up(B, _LANES))
    # Keep >= 2 grid steps at larger batches so dimension_semantics=("parallel",)
    # can hand work to both TensorCores of a v7x chip (harmless on v5e/v6e).
    if B > 2 * _LANES and pl.cdiv(B, TB) < 2:
        TB = _round_up(pl.cdiv(B, 2), _LANES)
    num_tiles = pl.cdiv(B, TB)

    itemsize = jnp.dtype(e1.dtype).itemsize
    cost = pl.CostEstimate(
        flops=3 * B * D,                       # diff + square + row reduction
        transcendentals=B,                     # sqrt per batch row
        bytes_accessed=2 * B * D * itemsize + B * 4,
    )

    out = pl.pallas_call(
        _make_kernel(B, TB),
        out_shape=jax.ShapeDtypeStruct((1, B), jnp.float32),
        grid=(num_tiles,),
        in_specs=[
            pl.BlockSpec((TB, D), lambda i: (i, 0)),
            pl.BlockSpec((TB, D), lambda i: (i, 0)),
        ],
        # Sublane dim 1 == full array dim (legal); lane dim TB is a multiple
        # of 128.  OOB columns in a ragged last block are simply not written.
        out_specs=pl.BlockSpec((1, TB), lambda i: (0, i)),
        compiler_params=pltpu.CompilerParams(
            dimension_semantics=("parallel",),   # independent batch tiles
        ),
        cost_estimate=cost,
    )(e1, e2)

    return out[0, :B]


def init_unused_fc_params(key):
    # Deterministic init of the (unused-in-forward) fc stack:
    # Linear(128,64) -> ReLU -> Linear(64,32) -> ReLU -> Linear(32,1)
    shapes = [(64, 128), (32, 64), (1, 32)]
    params = []
    for i, (out_f, in_f) in enumerate(shapes):
        kw, kb = jax.random.split(jax.random.fold_in(key, i))
        bound = 1.0 / (in_f ** 0.5)
        w = jax.random.uniform(kw, (out_f, in_f), jnp.float32, -bound, bound)
        b = jax.random.uniform(kb, (out_f,), jnp.float32, -bound, bound)
        params.append((w, b))
    return params


class SiameseNetworkPallas:
    def __init__(self, key):
        # TODO(synk): self.fc is never called in the PyTorch forward(); params
        # are created for fidelity only, no kernel is emitted for them.
        self.fc_params = init_unused_fc_params(key)

    def __call__(self, encoding1, encoding2):
        return pairwise_distance(encoding1, encoding2)


if __name__ == "__main__":
    key = jax.random.PRNGKey(0)
    k_params, k1, k2 = jax.random.split(key, 3)

    B, D = 8, 128  # module implies feature dim 128 (Linear(128, 64))
    encoding1 = jax.random.normal(k1, (B, D), dtype=jnp.float32)
    encoding2 = jax.random.normal(k2, (B, D), dtype=jnp.float32)

    model = SiameseNetworkPallas(k_params)
    dist = jax.block_until_ready(model(encoding1, encoding2))

    # Reference check in plain JAX (same semantics as torch pairwise_distance)
    ref = jnp.sqrt(jnp.sum((encoding1 - encoding2 + EPS) ** 2, axis=-1))
    assert dist.shape == (B,), dist.shape
    assert jnp.allclose(dist, ref, rtol=1e-5, atol=1e-4), float(jnp.max(jnp.abs(dist - ref)))

    print("KERNEL_OK")
</pallas_src>

<mosaic_0001>
module attributes {stable_mosaic.version = 11 : i64} {
  func.func @pairwise_distance_kernel(%arg0: i32, %arg1: memref<128x128xf32, #tpu.memory_space<vmem>>, %arg2: memref<128x128xf32, #tpu.memory_space<vmem>>, %arg3: memref<1x128xf32, #tpu.memory_space<vmem>>) attributes {dimension_semantics = [#tpu.dimension_semantics<parallel>], iteration_bounds = array<i64: 1>, scalar_prefetch = 0 : i64, scratch_operands = 0 : i64, tpu.core_type = #tpu.core_type<tc>, window_params = [{transform_indices = @transform_0, window_bounds = array<i64: 128, 128>}, {transform_indices = @transform_1, window_bounds = array<i64: 128, 128>}, {transform_indices = @transform_2, window_bounds = array<i64: 1, 128>}]} {
    %c0 = arith.constant 0 : index
    %c0_0 = arith.constant 0 : index
    %0 = vector.load %arg1[%c0, %c0_0] : memref<128x128xf32, #tpu.memory_space<vmem>>, vector<128x128xf32>
    %c0_1 = arith.constant 0 : index
    %c0_2 = arith.constant 0 : index
    %1 = vector.load %arg2[%c0_1, %c0_2] : memref<128x128xf32, #tpu.memory_space<vmem>>, vector<128x128xf32>
    %2 = arith.subf %0, %1 : vector<128x128xf32>
    %cst = arith.constant 9.99999997E-7 : f32
    %3 = vector.broadcast %cst : f32 to vector<128x128xf32>
    %4 = arith.addf %2, %3 : vector<128x128xf32>
    %5 = arith.mulf %4, %4 : vector<128x128xf32>
    %c128_i32 = arith.constant 128 : i32
    %6 = arith.muli %arg0, %c128_i32 : i32
    %7 = tpu.iota {dimensions = array<i32: 0>} : vector<128x1xi32>
    %8 = vector.broadcast %6 : i32 to vector<128x1xi32>
    %9 = arith.addi %8, %7 : vector<128x1xi32>
    %c8_i32 = arith.constant 8 : i32
    %10 = vector.broadcast %c8_i32 : i32 to vector<128x1xi32>
    %11 = arith.cmpi slt, %9, %10 : vector<128x1xi32>
    %cst_3 = arith.constant 0.000000e+00 : f32
    %12 = vector.shape_cast %11 : vector<128x1xi1> to vector<128x1xi1>
    %13 = vector.broadcast %12 : vector<128x1xi1> to vector<128x128xi1>
    %14 = vector.broadcast %cst_3 : f32 to vector<128x128xf32>
    %15 = arith.select %13, %5, %14 : vector<128x128xi1>, vector<128x128xf32>
    %cst_4 = arith.constant 1.000000e+00 : f32
    %16 = vector.broadcast %cst_4 : f32 to vector<1x128xf32>
    %cst_5 = arith.constant dense<0.000000e+00> : vector<1x128xf32>
    %17 = tpu.matmul %16, %15, %cst_5 {dimension_numbers = #tpu.dot_dimension_numbers<[1], [1], [0], [0], [0, 0, 1, 0], [], []>, precision = #tpu.contract_precision<fp32>} : vector<1x128xf32>, vector<128x128xf32>, vector<1x128xf32> -> vector<1x128xf32>
    %18 = math.sqrt %17 : vector<1x128xf32>
    %c0_6 = arith.constant 0 : index
    %c0_7 = arith.constant 0 : index
    %19 = vector.load %arg3[%c0_6, %c0_7] : memref<1x128xf32, #tpu.memory_space<vmem>>, vector<1x128xf32>
    tpu.vector_store %arg3[%c0_6, %c0_7], %18 {strides = array<i32>} : memref<1x128xf32, #tpu.memory_space<vmem>>, vector<1x128xf32>,
    return
  }
  func.func @transform_0(%arg0: i32) -> (i32, i32) {
    %c0_i32 = arith.constant 0 : i32
    %c0_i32_0 = arith.constant 0 : i32
    return %arg0, %c0_i32 : i32, i32
  }
  func.func @transform_1(%arg0: i32) -> (i32, i32) {
    %c0_i32 = arith.constant 0 : i32
    %c0_i32_0 = arith.constant 0 : i32
    return %arg0, %c0_i32 : i32, i32
  }
  func.func @transform_2(%arg0: i32) -> (i32, i32) {
    %c0_i32 = arith.constant 0 : i32
    %c0_i32_0 = arith.constant 0 : i32
    return %c0_i32, %arg0 : i32, i32
  }
}

</mosaic_0001>

<bundles_post_ra>
// kernel: tpu_custom_call.1
= control target key start
LH: loop header
LB: loop body
LE: loop exit
PB: predicated region body
PF: predicated region fallthrough
CT: control target
= control target key end

     0   :  { %7 = vsyncpa [#allocation3], 0  ;;  %s1027_s0 = inlined_call_operand.hbm [shape: f32[8,128], index: 0, kind: input, shape index: {}]   ;;  %s1028_s1 = inlined_call_operand.hbm [shape: f32[8,128], index: 1, kind: input, shape index: {}]   ;;  %s1029_s2 = inlined_call_operand.hbm [shape: f32[1,8], index: 2, kind: output, shape index: {}]  }
   0x1   :  { %8 = vsyncpa [#allocation6], 0 }
   0x2   :  { %9 = vsyncpa [#allocation4], 0 }
   0x3   :  { %14 = vsyncadd [#allocation3], 1920  ;;  %s989_s9 = smov [#allocation2]  }
   0x4   :  { %s15_s10 = sshll.u32 %s989_s9, 4  ;;  %s16_s10 = int_to_ptr.vmem [resolvable:$true] %s15_s10 }
   0x5   :  { %s931_s11 = scalar_lea.vmem %s16_s10, 128  ;;  %s935_s12 = scalar_lea.vmem %s16_s10, 2048 }
   0x6   :  { %p932_p0 = scmp.ne.s32.totalorder %s16_s10, %s931_s11  ;;  %p936_p1 = scmp.lt.s32.totalorder %s16_s10, %s16_s10 }
   0x7   :  { %p937_p2 = scmp.lt.s32.totalorder %s935_s12, %s931_s11 }
   0x9   :  { %p938_p3 = por %p937_p2, %p936_p1 }
   0xb   :  { %p939_p4 = pnand %p938_p3, %p932_p0 }
   0xd   :  { %942 = shalt.err (!%p939_p4)
}
   0xe   :  { %s990_s13 = smov 128   ;;  %s991_s14 = smov 8  }
   0xf   :  { %21 = dma.hbm_to_vmem [thread:$0]  %s1027_s0, 128, %s16_s10, [#allocation3], %s990_s13, %s990_s13, %s991_s14  }
  0x10   :  { %26 = vsyncadd [#allocation6], 1920  ;;  %s992_s17 = smov [#allocation5]  }
  0x11   :  { %s27_s18 = sshll.u32 %s992_s17, 4  ;;  %s28_s18 = int_to_ptr.vmem [resolvable:$true] %s27_s18 }
  0x12   :  { %s951_s19 = scalar_lea.vmem %s28_s18, 128  ;;  %s955_s20 = scalar_lea.vmem %s28_s18, 2048 }
  0x13   :  { %p952_p5 = scmp.ne.s32.totalorder %s28_s18, %s951_s19  ;;  %p956_p6 = scmp.lt.s32.totalorder %s28_s18, %s28_s18 }
  0x14   :  { %p957_p7 = scmp.lt.s32.totalorder %s955_s20, %s951_s19 }
  0x16   :  { %p958_p8 = por %p957_p7, %p956_p6 }
  0x18   :  { %p959_p9 = pnand %p958_p8, %p952_p5 }
  0x1a   :  { %962 = shalt.err (!%p959_p9)
}
  0x1b   :  { %33 = dma.hbm_to_vmem [thread:$0]  %s1028_s1, 128, %s28_s18, [#allocation6], %s990_s13, %s990_s13, %s991_s14  }
  0x1c   :  { %983 = dma.done.wait [#allocation3], 2048  }
  0x1d   :  { %984 = vsyncadd [#allocation3], 4294965248 }
  0x1e   :  { %985 = dma.done.wait [#allocation6], 2048  }
  0x1f   :  { %986 = vsyncadd [#allocation6], 4294965248  ;;  %v993_v0 = vmov 0.0   ;;  %vm994_vm0 = vmmov 0   ;;  %v40_v1 = vld [vmem:[#allocation2] sm:$0xff]  ;;  %v995_v11 = vmov 1.0  }
  0x20   :  { %883 = vmatprep.subr.mxu0 %v993_v0  ;;  %885 = vmatprep.mubr.msk.f32.mxu0 %vm994_vm0, %v993_v0  ;;  %v56_v2 = vld [vmem:[#allocation5] sm:$0xff]  ;;  %s996_s0 = smov [#allocation7]  }
  0x21   :  { %888 = vmatprep.subr.mxu1 %v993_v0  ;;  %890 = vmatprep.mubr.msk.f32.mxu1 %vm994_vm0, %v993_v0  ;;  %v72_v3 = vsub.f32 %v40_v1, %v56_v2  ;;  %s861_s1 = sshll.u32 %s996_s0, 4  ;;  %s862_s1 = int_to_ptr.vmem [resolvable:$true] %s861_s1 }
  0x22   :  { %s963_s23 = scalar_lea.vmem %s862_s1, 16  ;;  %s967_s24 = scalar_lea.vmem %s862_s1, 32 }
  0x23   :  { %v88_v4 = vadd.f32 1e-06, %v72_v3  ;;  %p964_p10 = scmp.ne.s32.totalorder %s862_s1, %s963_s23  ;;  %p968_p11 = scmp.lt.s32.totalorder %s862_s1, %s862_s1 }
  0x24   :  { %p969_p12 = scmp.lt.s32.totalorder %s967_s24, %s963_s23 }
  0x25   :  { %v104_v5 = vmul.f32 %v88_v4, %v88_v4 }
  0x26   :  { %p970_p13 = por %p969_p12, %p968_p11 }
  0x27   :  { %v265_v6 = vand.u32 4294901760, %v104_v5 }
  0x28   :  { %p971_p0 = pnand %p970_p13, %p964_p10 }
  0x29   :  { %884 = vmatpush3.xpose.msra.mxu0 %v265_v6  ;;  %v412_v7 = vsub.f32 %v104_v5, %v265_v6 }
  0x2a   :  { %893 = vmatprep.subr.mxu0 %v993_v0 }
  0x2b   :  { %v413_v8 = vand.u32 4294901760, %v412_v7 }
  0x2c   :  { %886 = vmatmul.mubr.f32.vlgmr.msra.gmra.mxu0 %v993_v0 }
  0x2d   :  { %v414_v9 = vsub.f32 %v412_v7, %v413_v8  ;;  %894 = vmatpush3.xpose.msra.mxu0 %v412_v7  ;;  %895 = vmatprep.mubr.msk.f32.mxu0 %vm994_vm0, %v993_v0 }
  0x2e   :  { %903 = vmatprep.subr.mxu0 %v993_v0 }
  0x2f   :  { %v415_v10 = vand.u32 4294901760, %v414_v9 }
  0x30   :  { %896 = vmatmul.mubr.f32.vlgmr.msra.gmra.mxu0 %v993_v0 }
  0x31   :  { %889 = vmatpush3.xpose.msra.mxu1 %v415_v10  ;;  %904 = vmatpush3.xpose.msra.mxu0 %v413_v8 }
  0x32   :  { %898 = vmatprep.subr.mxu1 %v993_v0  ;;  %905 = vmatprep.mubr.msk.f32.mxu0 %vm994_vm0, %v993_v0 }
  0x34   :  { %891 = vmatmul.mubr.f32.vlgmr.msra.gmra.mxu1 %v995_v11  ;;  %906 = vmatmul.mubr.f32.vlgmr.msra.gmra.mxu0 %v995_v11 }
  0x35   :  { %899 = vmatpush3.xpose.msra.mxu1 %v265_v6  ;;  %900 = vmatprep.mubr.msk.f32.mxu1 %vm994_vm0, %v993_v0 }
  0x36   :  { %908 = vmatprep.subr.mxu1 %v993_v0 }
  0x38   :  { %901 = vmatmul.mubr.f32.vlgmr.msra.gmra.mxu1 %v993_v0 }
  0x39   :  { %909 = vmatpush3.xpose.msra.mxu1 %v265_v6  ;;  %910 = vmatprep.mubr.msk.f32.mxu1 %vm994_vm0, %v993_v0 }
  0x3c   :  { %911 = vmatmul.mubr.f32.vlgmr.msra.gmra.mxu1 %v995_v11 }
  0xec   :  { %v301_v12 = vpop.f32.mrf.mxu0 }
  0xee   :  { %v887_v13 = vpop.f32.mrf.mxu0 }
  0xf0   :  { %v553_v14 = vpop.f32.mrf.mxu0 }
  0xf2   :  { %v897_v15 = vpop.f32.mrf.mxu0 }
  0xf4   :  { %v451_v16 = vpop.f32.mrf.mxu1  ;;  %v757_v17 = vpop.f32.mrf.mxu0 }
  0xf5   :  { %v452_v18 = vadd.f32 %v451_v16, %v301_v12 }
  0xf6   :  { %v892_v19 = vpop.f32.mrf.mxu1  ;;  %v907_v20 = vpop.f32.mrf.mxu0 }
  0xf7   :  { %v554_v21 = vadd.f32 %v553_v14, %v452_v18 }
  0xf8   :  { %v639_v22 = vpop.f32.mrf.mxu1 }
  0xf9   :  { %v640_v23 = vadd.f32 %v639_v22, %v554_v21 }
  0xfa   :  { %v902_v24 = vpop.f32.mrf.mxu1 }
  0xfb   :  { %v758_v25 = vadd.f32 %v757_v17, %v640_v23 }
  0xfc   :  { %v843_v26 = vpop.f32.mrf.mxu1 }
  0xfd   :  { %v844_v27 = vadd.f32 %v843_v26, %v758_v25 }
  0xfe   :  { %v912_v28 = vpop.f32.mrf.mxu1 }
  0xff   :  { %921 = vrsqrt.f32 %v844_v27  ;;  %vm849_vm1 = vcmp.eq.f32.partialorder %v844_v27, inf  ;;  %v852_v31 = vand.u32 2147483648, %v844_v27  ;;  %vm851_vm2 = vcmp.eq.f32.partialorder %v844_v27, 0.0 }
 0x10c   :  { %v922_v29 = vpop.eup %921 }
 0x10d   :  { %v848_v30 = vmul.f32 %v922_v29, %v844_v27 }
 0x10f   :  { %v850_v32 = vsel %vm849_vm1, %v844_v27, %v848_v30 }
 0x110   :  { %v853_v33 = vsel %vm851_vm2, %v852_v31, %v850_v32 }
 0x111   :  { %854 = vst [vmem:[#allocation7] sm:$0x1] %v853_v33 }
 0x112   :  { %974 = shalt.err (!%p971_p0)
}
 0x113   :  { %864 = dma.vmem_to_hbm [thread:$0]  %s862_s1, 16, %s1029_s2, [#allocation4]  }
 0x114   :  { %987 = dma.done.wait [#allocation4], 16  }
 0x115   :  { %988 = vsyncadd [#allocation4], 4294967280 }
 0x116   :  { %868 = vsyncpa [#allocation3], 1 }
 0x117   :  { %869 = vsyncpa [#allocation6], 1 }
 0x118   :  { %870 = vsyncpa [#allocation4], 1 }

</bundles_post_ra>
